<compile_context>
chip_gen: v7x
topology: tpu7x:2x2x1
jax: 0.10.0
libtpu: 0.0.40
codegen_flags: <defaults>
</compile_context>

<pallas_src>
import math

import jax
import jax.numpy as jnp
from jax import lax
from jax.experimental import pallas as pl
from jax.experimental.pallas import tpu as pltpu


_VMEM_LIMIT = 32 * 1024 * 1024  # explicit scoped-VMEM budget, safe on v5e/v6e/v7x


def _pick_tile(n, preferred=(512, 256, 128)):
    """Largest preferred tile that evenly divides n, else n itself."""
    for t in preferred:
        if n % t == 0:
            return t
    return n


# ---------------------------------------------------------------------------
# Row-tiled linear kernel:  y = x @ W + b
# ---------------------------------------------------------------------------
def _linear_kernel(x_ref, w_ref, b_ref, o_ref):
    acc = jnp.dot(x_ref[...], w_ref[...], preferred_element_type=jnp.float32)
    acc = acc + b_ref[...].astype(jnp.float32)      # (1, Dout) broadcasts
    o_ref[...] = acc.astype(o_ref.dtype)


def linear(x, w, b, *, out_dtype):
    """x: (R, Din), w: (Din, Dout), b: (1, Dout) float32 -> (R, Dout)."""
    R, Din = x.shape
    Dout = w.shape[1]
    tr = _pick_tile(R)

    const = dict(pipeline_mode=pl.Buffered(1))      # constant operands: 1 buffer
    return pl.pallas_call(
        _linear_kernel,
        out_shape=jax.ShapeDtypeStruct((R, Dout), out_dtype),
        grid_spec=pltpu.PrefetchScalarGridSpec(
            num_scalar_prefetch=0,
            grid=(R // tr,),
            in_specs=[
                pl.BlockSpec((tr, Din), lambda i: (i, 0)),
                pl.BlockSpec((Din, Dout), lambda i: (0, 0), **const),
                pl.BlockSpec((1, Dout), lambda i: (0, 0), **const),
            ],
            out_specs=pl.BlockSpec((tr, Dout), lambda i: (i, 0)),
        ),
        compiler_params=pltpu.CompilerParams(
            dimension_semantics=("parallel",),
            vmem_limit_bytes=_VMEM_LIMIT),
    )(x, w, b)


# ---------------------------------------------------------------------------
# Flash-attention kernel (online softmax), grid = (B*h, q_tiles, kv_tiles)
# ---------------------------------------------------------------------------
def _make_flash_kernel(scale):
    def kernel(q_ref, k_ref, v_ref, mask_ref, o_ref, m_sc, l_sc, acc_sc):
        ki = pl.program_id(2)

        @pl.when(ki == 0)
        def _():
            m_sc[...] = jnp.full_like(m_sc, -jnp.inf)
            l_sc[...] = jnp.zeros_like(l_sc)
            acc_sc[...] = jnp.zeros_like(acc_sc)

        q = q_ref[0]                                # (tq,  d_k)
        k = k_ref[0]                                # (tkv, d_k)
        v = v_ref[0]                                # (tkv, d_k)

        # scores = (q @ k^T) * scale — contract last dims, no physical .T
        s = lax.dot_general(q, k, (((1,), (1,)), ((), ())),
                            preferred_element_type=jnp.float32) * scale

        # masked_fill(mask == 0, -1e9); mask arrives as int8, compared once.
        mask = mask_ref[0].astype(jnp.int32)
        s = jnp.where(mask == 0, jnp.float32(-1e9), s)

        m_prev = m_sc[...]
        m_new = jnp.maximum(m_prev, jnp.max(s, axis=-1, keepdims=True))
        alpha = jnp.exp(m_prev - m_new)
        p = jnp.exp(s - m_new)
        l_sc[...] = alpha * l_sc[...] + jnp.sum(p, axis=-1, keepdims=True)
        acc_sc[...] = alpha * acc_sc[...] + jnp.dot(
            p.astype(v.dtype), v, preferred_element_type=jnp.float32)
        m_sc[...] = m_new

        @pl.when(ki == pl.num_programs(2) - 1)
        def _():
            inv_l = pl.reciprocal(l_sc[...], approx=True)   # EUP slot
            o_ref[0] = (acc_sc[...] * inv_l).astype(o_ref.dtype)

    return kernel


def flash_attention(q, k, v, mask_i8, *, h):
    """q, k, v: (B*h, S, d_k). mask_i8: (B, S, S) int8 (0 = masked)."""
    BH, S, d_k = q.shape
    scale = 1.0 / math.sqrt(d_k)
    tq = _pick_tile(S)
    tkv = _pick_tile(S)

    kernel = _make_flash_kernel(scale)

    q_spec = pl.BlockSpec((1, tq, d_k), lambda bh, qi, ki: (bh, qi, 0))
    kv_spec = pl.BlockSpec((1, tkv, d_k), lambda bh, qi, ki: (bh, ki, 0))
    mask_spec = pl.BlockSpec((1, tq, tkv), lambda bh, qi, ki: (bh // h, qi, ki))

    return pl.pallas_call(
        kernel,
        out_shape=jax.ShapeDtypeStruct((BH, S, d_k), q.dtype),
        grid_spec=pltpu.PrefetchScalarGridSpec(
            num_scalar_prefetch=0,
            grid=(BH, S // tq, S // tkv),
            in_specs=[q_spec, kv_spec, kv_spec, mask_spec],
            out_specs=pl.BlockSpec((1, tq, d_k), lambda bh, qi, ki: (bh, qi, 0)),
            scratch_shapes=[
                pltpu.VMEM((tq, 1), jnp.float32),     # m (running max)
                pltpu.VMEM((tq, 1), jnp.float32),     # l (running denom)
                pltpu.VMEM((tq, d_k), jnp.float32),   # acc
            ],
        ),
        compiler_params=pltpu.CompilerParams(
            dimension_semantics=("parallel", "parallel", "arbitrary"),
            vmem_limit_bytes=_VMEM_LIMIT),
    )(q, k, v, mask_i8)


# ---------------------------------------------------------------------------
# Full MultiHeadedAttention forward (eval mode)
# ---------------------------------------------------------------------------
def multi_headed_attention(q, k, v, mask, params, *, h,
                           compute_dtype=jnp.float32):
    """q, k, v: (B, S, D) f32; mask: (B, S, S), 0 = masked (broadcast over heads).

    compute_dtype=jnp.bfloat16 casts matmul operands for v6e/v7x MXU peak
    (accumulation and softmax remain f32).
    """
    B, S, D = q.shape
    assert D % h == 0
    d_k = D // h
    wq, bq, wk, bk, wv, bv, wo, bo = params
    cd = compute_dtype

    def proj_to_heads(x, w, b):
        y = linear(x.reshape(B * S, D).astype(cd), w.astype(cd), b, out_dtype=cd)
        # (B*S, D) -> (B*h, S, d_k): layout plumbing done by XLA outside kernel
        return y.reshape(B, S, h, d_k).transpose(0, 2, 1, 3).reshape(B * h, S, d_k)

    qh = proj_to_heads(q, wq, bq)
    kh = proj_to_heads(k, wk, bk)
    vh = proj_to_heads(v, wv, bv)

    mask_i8 = (mask != 0).astype(jnp.int8)          # 4x less HBM traffic than f32
    ctx = flash_attention(qh, kh, vh, mask_i8, h=h)  # (B*h, S, d_k)

    ctx = ctx.reshape(B, h, S, d_k).transpose(0, 2, 1, 3).reshape(B * S, D)
    out = linear(ctx, wo.astype(cd), bo, out_dtype=jnp.float32)
    return out.reshape(B, S, D)


# ---------------------------------------------------------------------------
# Pure-JAX reference (mirrors the PyTorch forward, eval mode)
# ---------------------------------------------------------------------------
def reference_mha(q, k, v, mask, params, *, h):
    B, S, D = q.shape
    d_k = D // h
    wq, bq, wk, bk, wv, bv, wo, bo = params

    def proj(x, w, b):
        y = x @ w + b[0]
        return y.reshape(B, S, h, d_k).transpose(0, 2, 1, 3)   # (B, h, S, d_k)

    Q, K, V = proj(q, wq, bq), proj(k, wk, bk), proj(v, wv, bv)
    scores = jnp.einsum('bhqd,bhkd->bhqk', Q, K) / math.sqrt(d_k)
    scores = jnp.where(mask[:, None, :, :] == 0, -1e9, scores)
    p = jax.nn.softmax(scores, axis=-1)
    x = jnp.einsum('bhqk,bhkd->bhqd', p, V)
    x = x.transpose(0, 2, 1, 3).reshape(B, S, D)
    return x @ wo + bo[0]


if __name__ == "__main__":
    B, S, D, H = 2, 8, 32, 4   # batch, seq, d_model, heads

    key = jax.random.PRNGKey(0)
    keys = jax.random.split(key, 12)

    q = jax.random.normal(keys[0], (B, S, D), dtype=jnp.float32)
    k = jax.random.normal(keys[1], (B, S, D), dtype=jnp.float32)
    v = jax.random.normal(keys[2], (B, S, D), dtype=jnp.float32)

    # causal-ish mask: 1 = keep, 0 = masked (matches masked_fill(mask == 0, -1e9))
    mask = jnp.tril(jnp.ones((S, S), dtype=jnp.float32))
    mask = jnp.broadcast_to(mask, (B, S, S))

    def init_linear(kw, kb):
        bound = 1.0 / math.sqrt(D)
        w = jax.random.uniform(kw, (D, D), jnp.float32, -bound, bound)
        b = jax.random.uniform(kb, (1, D), jnp.float32, -bound, bound)
        return w, b

    wq, bq = init_linear(keys[3], keys[4])
    wk, bk = init_linear(keys[5], keys[6])
    wv, bv = init_linear(keys[7], keys[8])
    wo, bo = init_linear(keys[9], keys[10])
    params = (wq, bq, wk, bk, wv, bv, wo, bo)

    ref = reference_mha(q, k, v, mask, params, h=H)

    # f32 operand path (default)
    out = multi_headed_attention(q, k, v, mask, params, h=H)
    out = jax.block_until_ready(out)
    assert out.shape == (B, S, D)
    assert jnp.allclose(out, ref, atol=2e-3, rtol=2e-3), "f32 path mismatch"

    # bf16 operand path (v6e/v7x MXU throughput; f32 accumulation & softmax)
    out_bf16 = multi_headed_attention(q, k, v, mask, params, h=H,
                                      compute_dtype=jnp.bfloat16)
    out_bf16 = jax.block_until_ready(out_bf16)
    assert jnp.allclose(out_bf16, ref, atol=5e-2, rtol=5e-2), "bf16 path mismatch"

    print("KERNEL_OK")
</pallas_src>

<mosaic_0001>
module attributes {stable_mosaic.version = 11 : i64} {
  func.func @_linear_kernel(%arg0: i32, %arg1: memref<16x32xf32, #tpu.memory_space<vmem>>, %arg2: memref<32x32xf32, #tpu.memory_space<vmem>>, %arg3: memref<1x32xf32, #tpu.memory_space<vmem>>, %arg4: memref<16x32xf32, #tpu.memory_space<vmem>>) attributes {dimension_semantics = [#tpu.dimension_semantics<parallel>], iteration_bounds = array<i64: 1>, scalar_prefetch = 0 : i64, scratch_operands = 0 : i64, tpu.core_type = #tpu.core_type<tc>, window_params = [{transform_indices = @transform_0, window_bounds = array<i64: 16, 32>}, {pipeline_mode = #tpu.pipeline_mode<synchronous>, transform_indices = @transform_1, window_bounds = array<i64: 32, 32>}, {pipeline_mode = #tpu.pipeline_mode<synchronous>, transform_indices = @transform_2, window_bounds = array<i64: 1, 32>}, {transform_indices = @transform_3, window_bounds = array<i64: 16, 32>}]} {
    %c0 = arith.constant 0 : index
    %c0_0 = arith.constant 0 : index
    %0 = vector.load %arg1[%c0, %c0_0] : memref<16x32xf32, #tpu.memory_space<vmem>>, vector<16x32xf32>
    %c0_1 = arith.constant 0 : index
    %c0_2 = arith.constant 0 : index
    %1 = vector.load %arg2[%c0_1, %c0_2] : memref<32x32xf32, #tpu.memory_space<vmem>>, vector<32x32xf32>
    %cst = arith.constant dense<0.000000e+00> : vector<16x32xf32>
    %2 = tpu.matmul %0, %1, %cst {dimension_numbers = #tpu.dot_dimension_numbers<[1], [0], [0], [1], [0, 0, 1, 1], [], []>} : vector<16x32xf32>, vector<32x32xf32>, vector<16x32xf32> -> vector<16x32xf32>
    %c0_3 = arith.constant 0 : index
    %c0_4 = arith.constant 0 : index
    %3 = vector.load %arg3[%c0_3, %c0_4] : memref<1x32xf32, #tpu.memory_space<vmem>>, vector<1x32xf32>
    %4 = vector.broadcast %3 : vector<1x32xf32> to vector<16x32xf32>
    %5 = arith.addf %2, %4 : vector<16x32xf32>
    %c0_5 = arith.constant 0 : index
    %c0_6 = arith.constant 0 : index
    %6 = vector.load %arg4[%c0_5, %c0_6] : memref<16x32xf32, #tpu.memory_space<vmem>>, vector<16x32xf32>
    tpu.vector_store %arg4[%c0_5, %c0_6], %5 {strides = array<i32>} : memref<16x32xf32, #tpu.memory_space<vmem>>, vector<16x32xf32>,
    return
  }
  func.func @transform_0(%arg0: i32) -> (i32, i32) {
    %c0_i32 = arith.constant 0 : i32
    %c0_i32_0 = arith.constant 0 : i32
    return %arg0, %c0_i32 : i32, i32
  }
  func.func @transform_1(%arg0: i32) -> (i32, i32) {
    %c0_i32 = arith.constant 0 : i32
    %c0_i32_0 = arith.constant 0 : i32
    %c0_i32_1 = arith.constant 0 : i32
    return %c0_i32, %c0_i32_0 : i32, i32
  }
  func.func @transform_2(%arg0: i32) -> (i32, i32) {
    %c0_i32 = arith.constant 0 : i32
    %c0_i32_0 = arith.constant 0 : i32
    %c0_i32_1 = arith.constant 0 : i32
    return %c0_i32, %c0_i32_0 : i32, i32
  }
  func.func @transform_3(%arg0: i32) -> (i32, i32) {
    %c0_i32 = arith.constant 0 : i32
    %c0_i32_0 = arith.constant 0 : i32
    return %arg0, %c0_i32 : i32, i32
  }
}

</mosaic_0001>

<bundles_post_ra>
// kernel: tpu_custom_call.1
= control target key start
LH: loop header
LB: loop body
LE: loop exit
PB: predicated region body
PF: predicated region fallthrough
CT: control target
= control target key end

     0   :  { %8 = vsyncpa [#allocation3], 0  ;;  %s340_s0 = inlined_call_operand.hbm [shape: f32[16,32], index: 0, kind: input, shape index: {}]   ;;  %s341_s1 = inlined_call_operand.hbm [shape: f32[32,32], index: 1, kind: input, shape index: {}]   ;;  %s342_s2 = inlined_call_operand.vmem [shape: f32[1,32], index: 2, kind: input, shape index: {}]   ;;  %s343_s3 = inlined_call_operand.hbm [shape: f32[16,32], index: 3, kind: output, shape index: {}]  }
   0x1   :  { %9 = vsyncpa [#allocation6], 0 }
   0x2   :  { %10 = vsyncpa [#allocation4], 0  ;;  %s263_s12 = smov [#allocation2]   ;;  %s191_s16 = scalar_lea.hbm %s340_s0, 256 }
   0x3   :  { %s16_s13 = sshll.u32 %s263_s12, 4  ;;  %p192_p0 = scmp.ne.s32.totalorder %s340_s0, %s191_s16  ;;  %s17_s13 = int_to_ptr.vmem [resolvable:$true] %s16_s13 }
   0x4   :  { %p195_p1 = scmp.lt.u32.totalorder %s191_s16, %s340_s0 }
   0x6   :  { %p197_p2 = pnand %p195_p1, %p192_p0 }
   0x8   :  { %200 = shalt.err (!%p197_p2)
}
   0x9   :  { %s201_s21 = scalar_lea.vmem %s17_s13, 256  ;;  %p206_p4 = scmp.lt.s32.totalorder %s17_s13, %s17_s13 }
   0xa   :  { %p202_p3 = scmp.ne.s32.totalorder %s17_s13, %s201_s21  ;;  %p207_p5 = scmp.lt.s32.totalorder %s201_s21, %s201_s21 }
   0xc   :  { %p208_p6 = por %p207_p5, %p206_p4 }
   0xe   :  { %p209_p7 = pnand %p208_p6, %p202_p3 }
  0x10   :  { %212 = shalt.err (!%p209_p7)
}
  0x11   :  { %s264_s22 = smov 128   ;;  %s265_s23 = smov 8  }
  0x12   :  { %22 = dma.hbm_to_vmem [thread:$0]  %s340_s0, 256, %s17_s13, [#allocation3], %s264_s22, %s264_s22, %s265_s23  }
  0x13   :  { %s266_s26 = smov [#allocation5]   ;;  %s213_s30 = scalar_lea.hbm %s341_s1, 512 }
  0x14   :  { %s28_s27 = sshll.u32 %s266_s26, 4  ;;  %p214_p8 = scmp.ne.s32.totalorder %s341_s1, %s213_s30  ;;  %s29_s27 = int_to_ptr.vmem [resolvable:$true] %s28_s27 }
  0x15   :  { %p217_p9 = scmp.lt.u32.totalorder %s213_s30, %s341_s1 }
  0x17   :  { %p219_p10 = pnand %p217_p9, %p214_p8 }
  0x19   :  { %222 = shalt.err (!%p219_p10)
}
  0x1a   :  { %s223_s8 = scalar_lea.vmem %s29_s27, 512  ;;  %p228_p12 = scmp.lt.s32.totalorder %s29_s27, %s29_s27 }
  0x1b   :  { %p224_p11 = scmp.ne.s32.totalorder %s29_s27, %s223_s8  ;;  %p229_p13 = scmp.lt.s32.totalorder %s223_s8, %s223_s8 }
  0x1d   :  { %p230_p0 = por %p229_p13, %p228_p12 }
  0x1f   :  { %p231_p1 = pnand %p230_p0, %p224_p11 }
  0x21   :  { %234 = shalt.err (!%p231_p1)
}
  0x22   :  { %34 = dma.hbm_to_vmem [thread:$0]  %s341_s1, 512, %s29_s27, [#allocation6], %s264_s22, %s264_s22, %s265_s23  }
  0x23   :  { %257 = dma.done.wait [#allocation3], 256  }
  0x24   :  { %258 = vsyncadd [#allocation3], 4294967040 }
  0x25   :  { %259 = dma.done.wait [#allocation6], 512  }
  0x26   :  { %260 = vsyncadd [#allocation6], 4294966784  ;;  %vm56_vm0 = vcmask 261120   ;;  %v45_v0 = vld [vmem:[#allocation5] sm:$0xff]  ;;  %v46_v1 = vld [vmem:[#allocation5 + $0x8] sm:$0xff]  ;;  %s267_s11 = smov [#allocation7]  }
  0x27   :  { %v47_v2 = vld [vmem:[#allocation5 + $0x10] sm:$0xff]  ;;  %v178_v3 = vpack.c.bf16 %v46_v1, %v45_v0  ;;  %v48_v4 = vld [vmem:[#allocation5 + $0x18] sm:$0xff]  ;;  %s145_s12 = sshll.u32 %s267_s11, 4  ;;  %s146_s12 = int_to_ptr.vmem [resolvable:$true] %s145_s12 }
  0x28   :  { %v43_v5 = vld [vmem:[#allocation2] sm:$0xff]  ;;  %v182_v6 = vpack.c.bf16 %v48_v4, %v47_v2  ;;  %v44_v7 = vld [vmem:[#allocation2 + $0x8] sm:$0xff]  ;;  %s235_s13 = scalar_lea.vmem %s146_s12, 256  ;;  %p240_p3 = scmp.lt.s32.totalorder %s146_s12, %s146_s12 }
  0x29   :  { %175 = vmatprep.mubr.msk.f32.mxu0 %vm56_vm0, %v43_v5  ;;  %179 = vmatprep.subr.bf16.mxu0 %v178_v3  ;;  %v158_v8 = vld [vmem:[%s342_s2] ss:$0 sm:$0xff]  ;;  %p236_p2 = scmp.ne.s32.totalorder %s146_s12, %s235_s13  ;;  %p241_p4 = scmp.lt.s32.totalorder %s235_s13, %s235_s13 }
  0x2a   :  { %181 = vmatpush3.bf16.msra.mxu0 %v178_v3 }
  0x2b   :  { %183 = vmatprep.subr.bf16.mxu0 %v182_v6  ;;  %p242_p5 = por %p241_p4, %p240_p3 }
  0x2d   :  { %p243_p6 = pnand %p242_p5, %p236_p2 }
  0x2e   :  { %185 = vmatpush3.bf16.msra.mxu0 %v182_v6 }
  0x31   :  { %176 = vmatmul.mubr.msk.f32.vlgmr.msra.gmra.mrb[0].mxu0 %vm56_vm0, %v44_v7 }
 0x104   :  { %v177_v9 = vpop.f32.mrb[0].mxu0 }
 0x105   :  { %v135_v10 = vadd.f32 %v177_v9, %v158_v8  ;;  %v129_v11 = vpop.f32.mrb[1].mxu0 }
 0x106   :  { %v130_v12 = vadd.f32 %v158_v8, %v129_v11 }
 0x107   :  { %139 = vst.msk [vmem:[#allocation7 + $0x8] sm:$0xff] %vm56_vm0, %v135_v10 }
 0x108   :  { %138 = vst.msk [vmem:[#allocation7] sm:$0xff] %vm56_vm0, %v130_v12 }
 0x109   :  { %246 = shalt.err (!%p243_p6)
}
 0x10a   :  { %s247_s15 = scalar_lea.hbm %s343_s3, 256 }
 0x10b   :  { %p248_p7 = scmp.ne.s32.totalorder %s343_s3, %s247_s15  ;;  %p251_p8 = scmp.lt.u32.totalorder %s247_s15, %s343_s3 }
 0x10d   :  { %p253_p9 = pnand %p251_p8, %p248_p7 }
 0x10f   :  { %256 = shalt.err (!%p253_p9)
}
 0x110   :  { %151 = dma.vmem_to_hbm [thread:$0]  %s146_s12, 256, %s343_s3, [#allocation4], %s264_s22, %s264_s22, %s265_s23  }
 0x111   :  { %261 = dma.done.wait [#allocation4], 256  }
 0x112   :  { %262 = vsyncadd [#allocation4], 4294967040 }
 0x113   :  { %155 = vsyncpa [#allocation3], 1 }
 0x114   :  { %156 = vsyncpa [#allocation6], 1 }
 0x115   :  { %157 = vsyncpa [#allocation4], 1 }

</bundles_post_ra>
